<compile_context>
chip_gen: v7x
topology: tpu7x:2x2x1
jax: 0.10.0
libtpu: 0.0.40
codegen_flags: <defaults>
</compile_context>

<pallas_src>
import jax
import jax.numpy as jnp
from jax.experimental import pallas as pl
from jax.experimental.pallas import tpu as pltpu

_LANE = 128


def mlp_kernel(x_ref, w1_ref, b1_ref, w2_ref, b2_ref, o_ref):
    # Cast x to bf16 in-kernel (VPU work hidden under MXU cadence; saves an HBM pass).
    x = x_ref[...].astype(jnp.bfloat16)
    # hidden = relu(x @ W1 + b1)   -- bf16 operands, f32 accumulate, f32 epilogue
    h = jnp.dot(x, w1_ref[...], preferred_element_type=jnp.float32)
    h = jnp.maximum(h + b1_ref[...], 0.0)
    # out = h @ W2 + b2            -- cast activations to bf16 only for the MXU
    o = jnp.dot(h.astype(jnp.bfloat16), w2_ref[...],
                preferred_element_type=jnp.float32)
    o_ref[...] = (o + b2_ref[...]).astype(o_ref.dtype)


def _round_up(n, m):
    return ((n + m - 1) // m) * m


def _cdiv(a, b):
    return -(-a // b)


def _vmem_bytes_per_row(K, N1, N2, x_itemsize, out_itemsize):
    """Per-batch-row VMEM footprint of one grid step (lane-padded, double-buffered I/O)."""
    x_row = _round_up(K, _LANE) * x_itemsize         # x tile row
    out_row = _round_up(N2, _LANE) * out_itemsize    # output tile row
    h_row = _round_up(N1, _LANE) * (4 + 2)           # f32 hidden + bf16 copy for 2nd dot
    return 2 * x_row + 2 * out_row + h_row           # x/out are double-buffered


def _weights_vmem_bytes(K, N1, N2):
    """Resident weights/biases (bf16 weights, f32 biases), conservatively x2 buffers."""
    w1 = _round_up(K, 16) * _round_up(N1, _LANE) * 2
    w2 = _round_up(N1, 16) * _round_up(N2, _LANE) * 2
    b1 = 8 * _round_up(N1, _LANE) * 4
    b2 = 8 * _round_up(N2, _LANE) * 4
    return 2 * (w1 + w2 + b1 + b2)


def mlp_forward(x, w1, b1, w2, b2, *, block_b=8192, vmem_budget_bytes=40 << 20):
    """x: (B, 20); w1: (20, 256); b1: (1, 256); w2: (256, 10); b2: (1, 10)."""
    B, K = x.shape
    N1 = w1.shape[1]
    N2 = w2.shape[1]
    out_dtype = x.dtype
    x_itemsize = x.dtype.itemsize
    out_itemsize = jnp.dtype(out_dtype).itemsize

    # Weights as bf16 (native MXU dtype; tiny one-off converts), biases f32 for epilogue.
    w1_bf = w1.astype(jnp.bfloat16)
    w2_bf = w2.astype(jnp.bfloat16)
    b1_f = b1.astype(jnp.float32)
    b2_f = b2.astype(jnp.float32)

    # --- Tile-size selection -------------------------------------------------
    per_row = _vmem_bytes_per_row(K, N1, N2, x_itemsize, out_itemsize)
    w_bytes = _weights_vmem_bytes(K, N1, N2)
    tb_cap = max(16, ((vmem_budget_bytes - w_bytes) // per_row) // 16 * 16)
    block_b = max(16, min(block_b, tb_cap))

    # Balanced tiling: near-equal tiles, padding < 16 rows per tile.
    num_tiles = _cdiv(B, block_b)
    if _round_up(B, 16) >= 32:
        # Keep >= 2 grid steps so v7x can shard batch tiles across its 2 TensorCores.
        num_tiles = max(2, num_tiles)
    tb = _round_up(_cdiv(B, num_tiles), 16)
    tb = min(tb, tb_cap)

    b_pad = _round_up(B, tb)
    if b_pad != B:
        x = jnp.pad(x, ((0, b_pad - B), (0, 0)))
    grid = (b_pad // tb,)

    # VMEM limit sized to the actual footprint plus headroom (never the whole chip).
    vmem_limit = min(int(per_row * tb + w_bytes + (4 << 20)), 100 << 20)

    cost = pl.CostEstimate(
        flops=2 * b_pad * (K * N1 + N1 * N2),
        transcendentals=0,
        bytes_accessed=(b_pad * K * x_itemsize            # x (native dtype)
                        + b_pad * N2 * out_itemsize       # out
                        + (K * N1 + N1 * N2) * 2          # weights (bf16)
                        + (N1 + N2) * 4),                 # biases (f32)
    )

    y_pad = pl.pallas_call(
        mlp_kernel,
        out_shape=jax.ShapeDtypeStruct((b_pad, N2), out_dtype),
        grid=grid,
        in_specs=[
            pl.BlockSpec((tb, K), lambda i: (i, 0)),    # x: tiled over batch
            pl.BlockSpec((K, N1), lambda i: (0, 0)),    # W1: VMEM-resident
            pl.BlockSpec((1, N1), lambda i: (0, 0)),    # b1: VMEM-resident
            pl.BlockSpec((N1, N2), lambda i: (0, 0)),   # W2: VMEM-resident
            pl.BlockSpec((1, N2), lambda i: (0, 0)),    # b2: VMEM-resident
        ],
        out_specs=pl.BlockSpec((tb, N2), lambda i: (i, 0)),
        compiler_params=pltpu.CompilerParams(
            dimension_semantics=("parallel",),
            vmem_limit_bytes=vmem_limit,
        ),
        cost_estimate=cost,
    )(x, w1_bf, b1_f, w2_bf, b2_f)

    return y_pad[:B]


def init_params(key):
    """Deterministic init matching nn.Linear shapes: hidden (256,20), output (10,256)."""
    k1, k2, k3, k4 = jax.random.split(key, 4)
    # PyTorch stores W as (out, in); we pre-transpose to (in, out) for the kernel.
    w1_t = jax.random.normal(k1, (256, 20), jnp.float32) * 0.05   # hidden.weight
    b1 = jax.random.normal(k2, (256,), jnp.float32) * 0.05        # hidden.bias
    w2_t = jax.random.normal(k3, (10, 256), jnp.float32) * 0.05   # output.weight
    b2 = jax.random.normal(k4, (10,), jnp.float32) * 0.05         # output.bias
    return (w1_t.T, b1.reshape(1, 256), w2_t.T, b2.reshape(1, 10))


def reference_forward(x, w1, b1, w2, b2):
    h = jnp.maximum(x @ w1 + b1, 0.0)
    return h @ w2 + b2


if __name__ == "__main__":
    key = jax.random.PRNGKey(0)
    kx, kp = jax.random.split(key)

    w1, b1, w2, b2 = init_params(kp)

    # Small-shape check (B=2, padded to one 16-row tile inside the wrapper).
    B = 2
    x = jax.random.normal(kx, (B, 20), jnp.float32)
    out = jax.block_until_ready(mlp_forward(x, w1, b1, w2, b2))
    ref = reference_forward(x, w1, b1, w2, b2)
    assert out.shape == (B, 10), out.shape
    assert jnp.allclose(out, ref, atol=2e-2, rtol=2e-2), "mismatch vs reference (B=2)"

    # Multi-tile check: balanced tiling (B=300, block_b=128 -> 3 tiles of 112 rows),
    # exercises grid > 1, tail padding, and the >=2-step guarantee.
    B2 = 300
    x2 = jax.random.normal(kx, (B2, 20), jnp.float32)
    out2 = jax.block_until_ready(mlp_forward(x2, w1, b1, w2, b2, block_b=128))
    ref2 = reference_forward(x2, w1, b1, w2, b2)
    assert out2.shape == (B2, 10), out2.shape
    assert jnp.allclose(out2, ref2, atol=2e-2, rtol=2e-2), "mismatch vs reference (B=300)"

    print("KERNEL_OK")
</pallas_src>

<mosaic_0001>
module attributes {stable_mosaic.version = 11 : i64} {
  func.func @mlp_kernel(%arg0: i32, %arg1: memref<16x20xf32, #tpu.memory_space<vmem>>, %arg2: memref<20x256xbf16, #tpu.memory_space<vmem>>, %arg3: memref<1x256xf32, #tpu.memory_space<vmem>>, %arg4: memref<256x10xbf16, #tpu.memory_space<vmem>>, %arg5: memref<1x10xf32, #tpu.memory_space<vmem>>, %arg6: memref<16x10xf32, #tpu.memory_space<vmem>>) attributes {dimension_semantics = [#tpu.dimension_semantics<parallel>], iteration_bounds = array<i64: 1>, scalar_prefetch = 0 : i64, scratch_operands = 0 : i64, tpu.core_type = #tpu.core_type<tc>, window_params = [{transform_indices = @transform_0, window_bounds = array<i64: 16, 20>}, {pipeline_mode = #tpu.pipeline_mode<synchronous>, transform_indices = @transform_1, window_bounds = array<i64: 20, 256>}, {pipeline_mode = #tpu.pipeline_mode<synchronous>, transform_indices = @transform_2, window_bounds = array<i64: 1, 256>}, {pipeline_mode = #tpu.pipeline_mode<synchronous>, transform_indices = @transform_3, window_bounds = array<i64: 256, 10>}, {pipeline_mode = #tpu.pipeline_mode<synchronous>, transform_indices = @transform_4, window_bounds = array<i64: 1, 10>}, {transform_indices = @transform_5, window_bounds = array<i64: 16, 10>}]} {
    %c0 = arith.constant 0 : index
    %c0_0 = arith.constant 0 : index
    %0 = vector.load %arg1[%c0, %c0_0] : memref<16x20xf32, #tpu.memory_space<vmem>>, vector<16x20xf32>
    %1 = arith.truncf %0 : vector<16x20xf32> to vector<16x20xbf16>
    %c0_1 = arith.constant 0 : index
    %c0_2 = arith.constant 0 : index
    %2 = vector.load %arg2[%c0_1, %c0_2] : memref<20x256xbf16, #tpu.memory_space<vmem>>, vector<20x256xbf16>
    %cst = arith.constant dense<0.000000e+00> : vector<16x256xf32>
    %3 = tpu.matmul %1, %2, %cst {dimension_numbers = #tpu.dot_dimension_numbers<[1], [0], [0], [1], [0, 0, 1, 1], [], []>} : vector<16x20xbf16>, vector<20x256xbf16>, vector<16x256xf32> -> vector<16x256xf32>
    %c0_3 = arith.constant 0 : index
    %c0_4 = arith.constant 0 : index
    %4 = vector.load %arg3[%c0_3, %c0_4] : memref<1x256xf32, #tpu.memory_space<vmem>>, vector<1x256xf32>
    %5 = vector.broadcast %4 : vector<1x256xf32> to vector<16x256xf32>
    %6 = arith.addf %3, %5 : vector<16x256xf32>
    %cst_5 = arith.constant 0.000000e+00 : f32
    %7 = vector.broadcast %cst_5 : f32 to vector<16x256xf32>
    %8 = arith.maximumf %6, %7 : vector<16x256xf32>
    %9 = arith.truncf %8 : vector<16x256xf32> to vector<16x256xbf16>
    %c0_6 = arith.constant 0 : index
    %c0_7 = arith.constant 0 : index
    %10 = vector.load %arg4[%c0_6, %c0_7] : memref<256x10xbf16, #tpu.memory_space<vmem>>, vector<256x10xbf16>
    %cst_8 = arith.constant dense<0.000000e+00> : vector<16x10xf32>
    %11 = tpu.matmul %9, %10, %cst_8 {dimension_numbers = #tpu.dot_dimension_numbers<[1], [0], [0], [1], [0, 0, 1, 1], [], []>} : vector<16x256xbf16>, vector<256x10xbf16>, vector<16x10xf32> -> vector<16x10xf32>
    %c0_9 = arith.constant 0 : index
    %c0_10 = arith.constant 0 : index
    %12 = vector.load %arg5[%c0_9, %c0_10] : memref<1x10xf32, #tpu.memory_space<vmem>>, vector<1x10xf32>
    %13 = vector.broadcast %12 : vector<1x10xf32> to vector<16x10xf32>
    %14 = arith.addf %11, %13 : vector<16x10xf32>
    %c0_11 = arith.constant 0 : index
    %c0_12 = arith.constant 0 : index
    %15 = vector.load %arg6[%c0_11, %c0_12] : memref<16x10xf32, #tpu.memory_space<vmem>>, vector<16x10xf32>
    tpu.vector_store %arg6[%c0_11, %c0_12], %14 {strides = array<i32>} : memref<16x10xf32, #tpu.memory_space<vmem>>, vector<16x10xf32>,
    return
  }
  func.func @transform_0(%arg0: i32) -> (i32, i32) {
    %c0_i32 = arith.constant 0 : i32
    %c0_i32_0 = arith.constant 0 : i32
    return %arg0, %c0_i32 : i32, i32
  }
  func.func @transform_1(%arg0: i32) -> (i32, i32) {
    %c0_i32 = arith.constant 0 : i32
    %c0_i32_0 = arith.constant 0 : i32
    %c0_i32_1 = arith.constant 0 : i32
    return %c0_i32, %c0_i32_0 : i32, i32
  }
  func.func @transform_2(%arg0: i32) -> (i32, i32) {
    %c0_i32 = arith.constant 0 : i32
    %c0_i32_0 = arith.constant 0 : i32
    %c0_i32_1 = arith.constant 0 : i32
    return %c0_i32, %c0_i32_0 : i32, i32
  }
  func.func @transform_3(%arg0: i32) -> (i32, i32) {
    %c0_i32 = arith.constant 0 : i32
    %c0_i32_0 = arith.constant 0 : i32
    %c0_i32_1 = arith.constant 0 : i32
    return %c0_i32, %c0_i32_0 : i32, i32
  }
  func.func @transform_4(%arg0: i32) -> (i32, i32) {
    %c0_i32 = arith.constant 0 : i32
    %c0_i32_0 = arith.constant 0 : i32
    %c0_i32_1 = arith.constant 0 : i32
    return %c0_i32, %c0_i32_0 : i32, i32
  }
  func.func @transform_5(%arg0: i32) -> (i32, i32) {
    %c0_i32 = arith.constant 0 : i32
    %c0_i32_0 = arith.constant 0 : i32
    return %arg0, %c0_i32 : i32, i32
  }
}

</mosaic_0001>

<bundles_post_ra>
// kernel: tpu_custom_call.1
= control target key start
LH: loop header
LB: loop body
LE: loop exit
PB: predicated region body
PF: predicated region fallthrough
CT: control target
= control target key end

     0   :  { %vm59_vm0 = vcmask 1041408   ;;  %v404_v3 = vmov 0   ;;  %vm55_vm1 = vcmask 162816   ;;  %s519_s0 = inlined_call_operand.vmem [shape: f32[16,20], index: 0, kind: input, shape index: {}]   ;;  %s520_s1 = inlined_call_operand.vmem [shape: bf16[20,256], index: 1, kind: input, shape index: {}]   ;;  %s521_s2 = inlined_call_operand.vmem [shape: f32[1,256], index: 2, kind: input, shape index: {}]   ;;  %s522_s3 = inlined_call_operand.vmem [shape: bf16[256,10], index: 3, kind: input, shape index: {}]   ;;  %s523_s4 = inlined_call_operand.vmem [shape: f32[1,10], index: 4, kind: input, shape index: {}]   ;;  %s524_s5 = inlined_call_operand.hbm [shape: f32[16,10], index: 5, kind: output, shape index: {}]  }
   0x1   :  { %v359_v0 = vld [vmem:[%s520_s1 + $0x4] ss:$8 sps:$4 sm:$0xff]   ;;  %v361_v1 = vld [vmem:[%s520_s1] ss:$8 sps:$4 sm:$0xff]   ;;  %v27_v2 = vld [vmem:[%s520_s1 + $0x10] sm:$0x33]  ;;  %98 = vmatprep.mubr.bf16.mxu0 %v404_v3 }
   0x2   :  { %v22_v4 = vld [vmem:[%s519_s0] sm:$0xff]  ;;  %66 = vmatprep.subr.bf16.mxu0 %v359_v0  ;;  %v313_v5 = vcombine.high %v27_v2, %v27_v2  ;;  %v312_v6 = vcombine.low %v27_v2, %v27_v2  ;;  %v23_v7 = vld [vmem:[%s519_s0 + $0x8] sm:$0xff]  ;;  %v368_v14 = vld [vmem:[%s522_s3 + $0x50] sm:$0xff]  }
   0x3   :  { %67 = vmatpush1.bf16.msra.mxu0 %v361_v1  ;;  %v364_v8 = vld [vmem:[%s522_s3 + $0x40] sm:$0xff]   ;;  %v366_v11 = vld [vmem:[%s522_s3 + $0x48] sm:$0xff]   ;;  %v24_v12 = vpack.c.bf16 %v23_v7, %v22_v4  ;;  %v369_v15 = vld [vmem:[%s522_s3 + $0x10] sm:$0xff]  }
   0x4   :  { %314 = vmatprep.subr.msk.bf16.mxu0 %vm59_vm0, %v313_v5  ;;  %v61_v9 = vsel %vm59_vm0, %v312_v6, 0  ;;  %v365_v10 = vld [vmem:[%s522_s3] sm:$0xff]   ;;  %333 = vmatprep.subr.bf16.mxu1 %v364_v8  ;;  %v367_v13 = vld [vmem:[%s522_s3 + $0x8] sm:$0xff]   ;;  %v370_v16 = vld [vmem:[%s522_s3 + $0x58] sm:$0xff]  }
   0x5   :  { %334 = vmatpush3.bf16.msra.mxu1 %v365_v10  ;;  %v371_v17 = vld [vmem:[%s522_s3 + $0x18] sm:$0xff]   ;;  %v372_v18 = vld [vmem:[%s522_s3 + $0x60] sm:$0xff]  }
   0x6   :  { %335 = vmatprep.subr.bf16.mxu1 %v366_v11 }
   0x7   :  { %69 = vmatpush1.bf16.msra.mxu0 %v61_v9 }
   0x9   :  { %336 = vmatpush3.bf16.msra.mxu1 %v367_v13 }
   0xa   :  { %315 = vmatmul.mubr.msk.bf16.vlgmr.msra.gmra.mrb[0].mxu0 %vm55_vm1, %v24_v12  ;;  %337 = vmatprep.subr.bf16.mxu1 %v368_v14 }
   0xd   :  { %338 = vmatpush3.bf16.msra.mxu1 %v369_v15 }
   0xe   :  { %339 = vmatprep.subr.bf16.mxu1 %v370_v16 }
   0xf   :  { %10 = vsyncpa [#allocation3], 0  ;;  %v373_v19 = vld [vmem:[%s522_s3 + $0x20] sm:$0xff]   ;;  %v374_v20 = vld [vmem:[%s522_s3 + $0x68] sm:$0xff]   ;;  %v30_v26 = vlaneseq  ;;  %s405_s0 = smov [#allocation2]   ;;  %vm291_vm2 = vcmask 80896  }
  0x10   :  { %v375_v21 = vld [vmem:[%s522_s3 + $0x28] sm:$0xff]   ;;  %v376_v22 = vld [vmem:[%s522_s3 + $0x70] sm:$0xff]   ;;  %v378_v24 = vld [vmem:[%s522_s3 + $0x78] sm:$0xff]   ;;  %s299_s9 = sshll.u32 %s405_s0, 4  ;;  %s300_s9 = int_to_ptr.vmem [resolvable:$true] %s299_s9 }
  0x11   :  { %340 = vmatpush3.bf16.msra.mxu1 %v371_v17  ;;  %v377_v23 = vld [vmem:[%s522_s3 + $0x30] sm:$0xff]   ;;  %v379_v25 = vld [vmem:[%s522_s3 + $0x38] sm:$0xff]   ;;  %v31_v27 = vshrl.u32 %v30_v26, 7  ;;  %v28_v29 = vld [vmem:[%s521_s2] sm:$0x3]  ;;  %s380_s10 = scalar_lea.vmem %s300_s9, 256  ;;  %p385_p1 = scmp.lt.s32.totalorder %s300_s9, %s300_s9 }
  0x12   :  { %341 = vmatprep.subr.bf16.mxu1 %v372_v18  ;;  %v316_v48 = vld [vmem:[%s523_s4] ss:$0 sm:$0xff]  ;;  %p381_p0 = scmp.ne.s32.totalorder %s300_s9, %s380_s10  ;;  %p386_p2 = scmp.lt.s32.totalorder %s380_s10, %s380_s10 }
  0x13   :  { %v32_v28 = vsub.s32 0, %v31_v27  ;;  %v36_v30 = vsub.s32 1, %v31_v27 }
  0x14   :  { %p387_p3 = por %p386_p2, %p385_p1 }
  0x15   :  { %342 = vmatpush3.bf16.msra.mxu1 %v373_v19  ;;  %v33_v31 = vrot.slane %v28_v29, %v32_v28  ;;  %v37_v32 = vrot.slane %v28_v29, %v36_v30 }
  0x16   :  { %343 = vmatprep.subr.bf16.mxu1 %v374_v20  ;;  %p388_p4 = pnand %p387_p3, %p381_p0 }
  0x19   :  { %344 = vmatpush3.bf16.msra.mxu1 %v375_v21 }
  0x1a   :  { %345 = vmatprep.subr.bf16.mxu1 %v376_v22 }
  0x1d   :  { %346 = vmatpush3.bf16.msra.mxu1 %v377_v23 }
  0x1e   :  { %347 = vmatprep.subr.bf16.mxu1 %v378_v24 }
  0x21   :  { %348 = vmatpush3.bf16.msra.mxu1 %v379_v25 }
  0xdd   :  { %v100_v33 = vpop.f32.mrb[0].mxu0 }
  0xde   :  { %v101_v34 = vadd.f32 %v100_v33, %v33_v31  ;;  %v102_v35 = vpop.f32.mrb[1].mxu0 }
  0xdf   :  { %v103_v36 = vadd.f32 %v102_v35, %v37_v32  ;;  %v104_v37 = vpop.f32.mrb[2].mxu0 }
  0xe0   :  { %v105_v38 = vadd.f32 %v104_v37, %v33_v31  ;;  %v106_v39 = vpop.f32.mrb[3].mxu0  ;;  %v109_v41 = vmax.f32 %v101_v34, 0.0 }
  0xe1   :  { %v107_v40 = vadd.f32 %v106_v39, %v37_v32  ;;  %v110_v43 = vmax.f32 %v103_v36, 0.0 }
  0xe2   :  { %v111_v42 = vmax.f32 %v105_v38, 0.0 }
  0xe3   :  { %v112_v44 = vmax.f32 %v107_v40, 0.0 }
  0xe4   :  { %v113_v45 = vpack.c.bf16 %v111_v42, %v109_v41 }
  0xe5   :  { %v114_v46 = vpack.c.bf16 %v112_v44, %v110_v43 }
  0xe7   :  { %282 = vmatprep.mubr.bf16.mxu1 %v114_v46 }
  0xe8   :  { %283 = vmatmul.mubr.bf16.vlgmr.msra.gmra.mrb[0].mxu1 %v113_v45 }
 0x1bb   :  { %v349_v47 = vpop.f32.mrb[0].mxu1 }
 0x1bc   :  { %v350_v49 = vpop.f32.mrb[1].mxu1 }
 0x1bd   :  { %v351_v50 = vadd.f32 %v350_v49, %v349_v47  ;;  %v352_v51 = vpop.f32.mrb[2].mxu1 }
 0x1be   :  { %v353_v52 = vpop.f32.mrb[3].mxu1 }
 0x1bf   :  { %v285_v53 = vadd.f32 %v351_v50, %v316_v48  ;;  %v354_v54 = vadd.f32 %v353_v52, %v352_v51 }
 0x1c1   :  { %292 = vst.msk [vmem:[#allocation2] sm:$0xff] %vm291_vm2, %v285_v53  ;;  %v288_v55 = vadd.f32 %v354_v54, %v316_v48 }
 0x1c3   :  { %293 = vst.msk [vmem:[#allocation2 + $0x8] sm:$0xff] %vm291_vm2, %v288_v55 }
 0x1c4   :  { %391 = shalt.err (!%p388_p4)
}
 0x1c5   :  { %s392_s12 = scalar_lea.hbm %s524_s5, 256 }
 0x1c6   :  { %p393_p5 = scmp.ne.s32.totalorder %s524_s5, %s392_s12  ;;  %p396_p6 = scmp.lt.u32.totalorder %s392_s12, %s524_s5 }
 0x1c8   :  { %p398_p7 = pnand %p396_p6, %p393_p5 }
 0x1ca   :  { %401 = shalt.err (!%p398_p7)
}
 0x1cb   :  { %s406_s17 = smov 128   ;;  %s407_s18 = smov 8  }
 0x1cc   :  { %305 = dma.vmem_to_hbm [thread:$0]  %s300_s9, 256, %s524_s5, [#allocation3], %s406_s17, %s406_s17, %s407_s18  }
 0x1cd   :  { %402 = dma.done.wait [#allocation3], 256  }
 0x1ce   :  { %403 = vsyncadd [#allocation3], 4294967040 }
 0x1cf   :  { %309 = vsyncpa [#allocation3], 1 }

</bundles_post_ra>
